<compile_context>
chip_gen: v5e
topology: v5e:2x2
jax: 0.10.0
libtpu: 0.0.40
codegen_flags: <defaults>
</compile_context>

<pallas_src>
import jax
import jax.numpy as jnp
from jax.experimental import pallas as pl
from jax.experimental.pallas import tpu as pltpu

IMG_FEAT = 512
TXT_FEAT = 512
IN_DIM = IMG_FEAT + TXT_FEAT   # 1024
HID_DIM = 256
OUT_DIM = 2
OUT_PAD = 8                    # small padded output width (full-dim block)
SMALL_TWO_TC_B = 256           # above this, force >=2 tiles on 2-TC chips


def _round_up(x, m):
    return ((x + m - 1) // m) * m


def _device_kind():
    try:
        return jax.devices()[0].device_kind.lower()
    except Exception:
        return ""


def _choose_batch_tile(B):
    """Per-generation batch tile.

    v5e: 512 (fits 16 MiB default scoped VMEM with double buffering).
    v6e/v7x: 2048 (~18 MiB double-buffered f32; amortizes per-step overhead).
    v7x: additionally force >= 2 grid steps for B > 256 so both TensorCores
    get work on the "parallel" batch axis.
    """
    kind = _device_kind()
    if "v5" in kind:
        tb_max = 512
    elif "v6" in kind or "v7" in kind:
        tb_max = 2048
    else:
        tb_max = 1024
    if "v7" in kind and B > SMALL_TWO_TC_B:
        tb_max = min(tb_max, _round_up(pl.cdiv(B, 2), 8))
    return B if B <= tb_max else tb_max


def _mlp_head_kernel(img_ref, txt_ref, w1i_ref, w1t_ref, b1_ref,
                     w2_ref, b2_ref, o_ref):
    # img_ref: (tb, 512), txt_ref: (tb, 512)  [f32 or bf16 in HBM]
    # w1i_ref: (512, 256), w1t_ref: (512, 256)  [bf16], b1_ref: (1, 256) f32
    # w2_ref:  (256, 8) f32 zero-padded beyond col 2, b2_ref: (1, 8) f32
    # o_ref:   (tb, 8) f32
    #
    # Cast matmul operands to bf16 for MXU-native rate (no-op if already
    # bf16); accumulate in f32.
    img = img_ref[...].astype(jnp.bfloat16)
    txt = txt_ref[...].astype(jnp.bfloat16)
    w1i = w1i_ref[...].astype(jnp.bfloat16)
    w1t = w1t_ref[...].astype(jnp.bfloat16)

    h = (jnp.dot(img, w1i, preferred_element_type=jnp.float32)
         + jnp.dot(txt, w1t, preferred_element_type=jnp.float32)
         + b1_ref[...])
    h = jnp.maximum(h, 0.0)                                   # ReLU
    # Second layer is tiny (K=256, N=8): keep it f32 for logit precision.
    y = jnp.dot(h, w2_ref[...], preferred_element_type=jnp.float32) + b2_ref[...]
    o_ref[...] = y.astype(o_ref.dtype)


def prepare_clip_fc_params(w1, b1, w2, b2, *, weights_bf16=True):
    """One-time parameter transform (call at init, not per forward).

    Splits fc1's weight into image/text halves (fuses the concat away),
    zero-pads fc2 to OUT_PAD lanes, and (optionally) casts the large fc1
    weights to bf16 to halve their HBM read traffic.
    """
    w1 = w1.astype(jnp.float32)
    w1_img = w1[:IMG_FEAT]            # (512, 256)
    w1_txt = w1[IMG_FEAT:]            # (512, 256)
    if weights_bf16:
        w1_img = w1_img.astype(jnp.bfloat16)
        w1_txt = w1_txt.astype(jnp.bfloat16)
    b1_2d = b1.reshape(1, HID_DIM).astype(jnp.float32)
    w2_pad = jnp.zeros((HID_DIM, OUT_PAD), jnp.float32).at[:, :OUT_DIM].set(
        w2.astype(jnp.float32))
    b2_pad = jnp.zeros((1, OUT_PAD), jnp.float32).at[:, :OUT_DIM].set(
        b2.reshape(1, OUT_DIM).astype(jnp.float32))
    return (w1_img, w1_txt, b1_2d, w2_pad, b2_pad)


def clip_fc_head(image_features, text_features, params, *, tb=None):
    """Pallas implementation of clip_fc's trainable head.

    image_features: (B, 512)  (f32, or bf16 if the producer already emits it)
    text_features:  (B, 512)
    params: output of prepare_clip_fc_params
    returns y_pred: (B, 2) float32
    """
    w1_img, w1_txt, b1_2d, w2_pad, b2_pad = params
    B = image_features.shape[0]

    if tb is None:
        tb = _choose_batch_tile(B)
    num_tiles = pl.cdiv(B, tb)

    # Raise the scoped-VMEM limit only when the big-tile path needs it
    # (TB=2048 f32 double-buffered inputs ~16 MiB + ~1.2 MiB weights).
    vmem_limit = (40 * 1024 * 1024) if tb > 512 else None

    y_pad = pl.pallas_call(
        _mlp_head_kernel,
        out_shape=jax.ShapeDtypeStruct((B, OUT_PAD), jnp.float32),
        grid_spec=pl.GridSpec(
            grid=(num_tiles,),
            in_specs=[
                pl.BlockSpec((tb, IMG_FEAT), lambda i: (i, 0)),
                pl.BlockSpec((tb, TXT_FEAT), lambda i: (i, 0)),
                pl.BlockSpec((IMG_FEAT, HID_DIM), lambda i: (0, 0)),
                pl.BlockSpec((TXT_FEAT, HID_DIM), lambda i: (0, 0)),
                pl.BlockSpec((1, HID_DIM), lambda i: (0, 0)),
                pl.BlockSpec((HID_DIM, OUT_PAD), lambda i: (0, 0)),
                pl.BlockSpec((1, OUT_PAD), lambda i: (0, 0)),
            ],
            out_specs=pl.BlockSpec((tb, OUT_PAD), lambda i: (i, 0)),
        ),
        compiler_params=pltpu.CompilerParams(
            dimension_semantics=("parallel",),
            vmem_limit_bytes=vmem_limit),
    )(image_features, text_features, w1_img, w1_txt, b1_2d, w2_pad, b2_pad)

    return y_pad[:, :OUT_DIM]


def _reference(image_features, text_features, w1, b1, w2, b2):
    z = jnp.concatenate([image_features, text_features], axis=1)
    h = jnp.maximum(z @ w1 + b1, 0.0)
    return h @ w2 + b2


if __name__ == "__main__":
    key = jax.random.PRNGKey(0)
    k_img, k_txt, k_w1, k_b1, k_w2, k_b2 = jax.random.split(key, 6)

    # TODO(synk): CLIP ViT-B/32 encode_image / encode_text (and the tokenizer)
    # are a frozen external model; their 512-d outputs are synthesized here.
    B = 8
    image_features = jax.random.normal(k_img, (B, IMG_FEAT), jnp.float32)
    text_features = jax.random.normal(k_txt, (B, TXT_FEAT), jnp.float32)

    # Deterministic parameter init (uniform like nn.Linear default bounds).
    lim1 = 1.0 / (IN_DIM ** 0.5)
    lim2 = 1.0 / (HID_DIM ** 0.5)
    w1 = jax.random.uniform(k_w1, (IN_DIM, HID_DIM), jnp.float32, -lim1, lim1)
    b1 = jax.random.uniform(k_b1, (HID_DIM,), jnp.float32, -lim1, lim1)
    w2 = jax.random.uniform(k_w2, (HID_DIM, OUT_DIM), jnp.float32, -lim2, lim2)
    b2 = jax.random.uniform(k_b2, (OUT_DIM,), jnp.float32, -lim2, lim2)

    params = prepare_clip_fc_params(w1, b1, w2, b2)

    # Small-batch (single-tile) path.
    y = clip_fc_head(image_features, text_features, params)
    y = jax.block_until_ready(y)
    y_ref = _reference(image_features, text_features, w1, b1, w2, b2)
    assert y.shape == (B, OUT_DIM)
    # bf16 matmul operands with f32 accumulation -> loosened tolerance.
    assert jnp.allclose(y, y_ref, atol=3e-2, rtol=3e-2)

    # Non-divisible / multi-tile path (exercises masked partial last block).
    B2 = 300
    k_img2, k_txt2 = jax.random.split(jax.random.PRNGKey(1), 2)
    img2 = jax.random.normal(k_img2, (B2, IMG_FEAT), jnp.float32)
    txt2 = jax.random.normal(k_txt2, (B2, TXT_FEAT), jnp.float32)
    y2 = jax.block_until_ready(clip_fc_head(img2, txt2, params))
    y2_ref = _reference(img2, txt2, w1, b1, w2, b2)
    assert y2.shape == (B2, OUT_DIM)
    assert jnp.allclose(y2, y2_ref, atol=3e-2, rtol=3e-2)

    print("KERNEL_OK")
</pallas_src>

<mosaic_0001>
module attributes {stable_mosaic.version = 11 : i64} {
  func.func @_mlp_head_kernel(%arg0: i32, %arg1: memref<8x512xf32, #tpu.memory_space<vmem>>, %arg2: memref<8x512xf32, #tpu.memory_space<vmem>>, %arg3: memref<512x256xbf16, #tpu.memory_space<vmem>>, %arg4: memref<512x256xbf16, #tpu.memory_space<vmem>>, %arg5: memref<1x256xf32, #tpu.memory_space<vmem>>, %arg6: memref<256x8xf32, #tpu.memory_space<vmem>>, %arg7: memref<1x8xf32, #tpu.memory_space<vmem>>, %arg8: memref<8x8xf32, #tpu.memory_space<vmem>>) attributes {dimension_semantics = [#tpu.dimension_semantics<parallel>], iteration_bounds = array<i64: 1>, scalar_prefetch = 0 : i64, scratch_operands = 0 : i64, tpu.core_type = #tpu.core_type<tc>, window_params = [{transform_indices = @transform_0, window_bounds = array<i64: 8, 512>}, {transform_indices = @transform_1, window_bounds = array<i64: 8, 512>}, {pipeline_mode = #tpu.pipeline_mode<synchronous>, transform_indices = @transform_2, window_bounds = array<i64: 512, 256>}, {pipeline_mode = #tpu.pipeline_mode<synchronous>, transform_indices = @transform_3, window_bounds = array<i64: 512, 256>}, {pipeline_mode = #tpu.pipeline_mode<synchronous>, transform_indices = @transform_4, window_bounds = array<i64: 1, 256>}, {pipeline_mode = #tpu.pipeline_mode<synchronous>, transform_indices = @transform_5, window_bounds = array<i64: 256, 8>}, {pipeline_mode = #tpu.pipeline_mode<synchronous>, transform_indices = @transform_6, window_bounds = array<i64: 1, 8>}, {transform_indices = @transform_7, window_bounds = array<i64: 8, 8>}]} {
    %c0 = arith.constant 0 : index
    %c0_0 = arith.constant 0 : index
    %0 = vector.load %arg1[%c0, %c0_0] : memref<8x512xf32, #tpu.memory_space<vmem>>, vector<8x512xf32>
    %1 = arith.truncf %0 : vector<8x512xf32> to vector<8x512xbf16>
    %c0_1 = arith.constant 0 : index
    %c0_2 = arith.constant 0 : index
    %2 = vector.load %arg2[%c0_1, %c0_2] : memref<8x512xf32, #tpu.memory_space<vmem>>, vector<8x512xf32>
    %3 = arith.truncf %2 : vector<8x512xf32> to vector<8x512xbf16>
    %c0_3 = arith.constant 0 : index
    %c0_4 = arith.constant 0 : index
    %4 = vector.load %arg3[%c0_3, %c0_4] : memref<512x256xbf16, #tpu.memory_space<vmem>>, vector<512x256xbf16>
    %c0_5 = arith.constant 0 : index
    %c0_6 = arith.constant 0 : index
    %5 = vector.load %arg4[%c0_5, %c0_6] : memref<512x256xbf16, #tpu.memory_space<vmem>>, vector<512x256xbf16>
    %cst = arith.constant dense<0.000000e+00> : vector<8x256xf32>
    %6 = tpu.matmul %1, %4, %cst {dimension_numbers = #tpu.dot_dimension_numbers<[1], [0], [0], [1], [0, 0, 1, 1], [], []>} : vector<8x512xbf16>, vector<512x256xbf16>, vector<8x256xf32> -> vector<8x256xf32>
    %cst_7 = arith.constant dense<0.000000e+00> : vector<8x256xf32>
    %7 = tpu.matmul %3, %5, %cst_7 {dimension_numbers = #tpu.dot_dimension_numbers<[1], [0], [0], [1], [0, 0, 1, 1], [], []>} : vector<8x512xbf16>, vector<512x256xbf16>, vector<8x256xf32> -> vector<8x256xf32>
    %8 = arith.addf %6, %7 : vector<8x256xf32>
    %c0_8 = arith.constant 0 : index
    %c0_9 = arith.constant 0 : index
    %9 = vector.load %arg5[%c0_8, %c0_9] : memref<1x256xf32, #tpu.memory_space<vmem>>, vector<1x256xf32>
    %10 = vector.broadcast %9 : vector<1x256xf32> to vector<8x256xf32>
    %11 = arith.addf %8, %10 : vector<8x256xf32>
    %cst_10 = arith.constant 0.000000e+00 : f32
    %12 = vector.broadcast %cst_10 : f32 to vector<8x256xf32>
    %13 = arith.maximumf %11, %12 : vector<8x256xf32>
    %c0_11 = arith.constant 0 : index
    %c0_12 = arith.constant 0 : index
    %14 = vector.load %arg6[%c0_11, %c0_12] : memref<256x8xf32, #tpu.memory_space<vmem>>, vector<256x8xf32>
    %cst_13 = arith.constant dense<0.000000e+00> : vector<8x8xf32>
    %15 = tpu.matmul %13, %14, %cst_13 {dimension_numbers = #tpu.dot_dimension_numbers<[1], [0], [0], [1], [0, 0, 1, 1], [], []>} : vector<8x256xf32>, vector<256x8xf32>, vector<8x8xf32> -> vector<8x8xf32>
    %c0_14 = arith.constant 0 : index
    %c0_15 = arith.constant 0 : index
    %16 = vector.load %arg7[%c0_14, %c0_15] : memref<1x8xf32, #tpu.memory_space<vmem>>, vector<1x8xf32>
    %17 = vector.broadcast %16 : vector<1x8xf32> to vector<8x8xf32>
    %18 = arith.addf %15, %17 : vector<8x8xf32>
    %c0_16 = arith.constant 0 : index
    %c0_17 = arith.constant 0 : index
    %19 = vector.load %arg8[%c0_16, %c0_17] : memref<8x8xf32, #tpu.memory_space<vmem>>, vector<8x8xf32>
    tpu.vector_store %arg8[%c0_16, %c0_17], %18 {strides = array<i32>} : memref<8x8xf32, #tpu.memory_space<vmem>>, vector<8x8xf32>,
    return
  }
  func.func @transform_0(%arg0: i32) -> (i32, i32) {
    %c0_i32 = arith.constant 0 : i32
    %c0_i32_0 = arith.constant 0 : i32
    return %arg0, %c0_i32 : i32, i32
  }
  func.func @transform_1(%arg0: i32) -> (i32, i32) {
    %c0_i32 = arith.constant 0 : i32
    %c0_i32_0 = arith.constant 0 : i32
    return %arg0, %c0_i32 : i32, i32
  }
  func.func @transform_2(%arg0: i32) -> (i32, i32) {
    %c0_i32 = arith.constant 0 : i32
    %c0_i32_0 = arith.constant 0 : i32
    %c0_i32_1 = arith.constant 0 : i32
    return %c0_i32, %c0_i32_0 : i32, i32
  }
  func.func @transform_3(%arg0: i32) -> (i32, i32) {
    %c0_i32 = arith.constant 0 : i32
    %c0_i32_0 = arith.constant 0 : i32
    %c0_i32_1 = arith.constant 0 : i32
    return %c0_i32, %c0_i32_0 : i32, i32
  }
  func.func @transform_4(%arg0: i32) -> (i32, i32) {
    %c0_i32 = arith.constant 0 : i32
    %c0_i32_0 = arith.constant 0 : i32
    %c0_i32_1 = arith.constant 0 : i32
    return %c0_i32, %c0_i32_0 : i32, i32
  }
  func.func @transform_5(%arg0: i32) -> (i32, i32) {
    %c0_i32 = arith.constant 0 : i32
    %c0_i32_0 = arith.constant 0 : i32
    %c0_i32_1 = arith.constant 0 : i32
    return %c0_i32, %c0_i32_0 : i32, i32
  }
  func.func @transform_6(%arg0: i32) -> (i32, i32) {
    %c0_i32 = arith.constant 0 : i32
    %c0_i32_0 = arith.constant 0 : i32
    %c0_i32_1 = arith.constant 0 : i32
    return %c0_i32, %c0_i32_0 : i32, i32
  }
  func.func @transform_7(%arg0: i32) -> (i32, i32) {
    %c0_i32 = arith.constant 0 : i32
    %c0_i32_0 = arith.constant 0 : i32
    return %arg0, %c0_i32 : i32, i32
  }
}

</mosaic_0001>

<bundles_post_ra>
// kernel: tpu_custom_call.1
= control target key start
LH: loop header
LB: loop body
LE: loop exit
PB: predicated region body
PF: predicated region fallthrough
CT: control target
= control target key end

     0   :  { %12 = vsyncpa [#allocation3], 0  ;;  %s2105_s0 = inlined_call_operand.vmem [shape: f32[8,512], index: 0, kind: input, shape index: {}]   ;;  %s2106_s1 = inlined_call_operand.vmem [shape: f32[8,512], index: 1, kind: input, shape index: {}]   ;;  %s2107_s2 = inlined_call_operand.hbm [shape: bf16[512,256], index: 2, kind: input, shape index: {}]   ;;  %s2108_s3 = inlined_call_operand.hbm [shape: bf16[512,256], index: 3, kind: input, shape index: {}]   ;;  %s2109_s4 = inlined_call_operand.vmem [shape: f32[1,256], index: 4, kind: input, shape index: {}]   ;;  %s2110_s5 = inlined_call_operand.vmem [shape: f32[256,8], index: 5, kind: input, shape index: {}]   ;;  %s2111_s6 = inlined_call_operand.vmem [shape: f32[1,8], index: 6, kind: input, shape index: {}]   ;;  %s2112_s7 = inlined_call_operand.hbm [shape: f32[8,8], index: 7, kind: output, shape index: {}]  }
   0x1   :  { %13 = vsyncpa [#allocation6], 0 }
   0x2   :  { %14 = vsyncpa [#allocation4], 0  ;;  %s23_s26 = sshll.u32 %s2107_s2, 4  ;;  %s1881_s27 = smov [#allocation2]   ;;  %s24_s26 = int_to_ptr.hbm [resolvable:$true] %s23_s26 }
   0x3   :  { %s25_s28 = sshll.u32 %s1881_s27, 4  ;;  %s36_s8 = sshll.u32 %s2108_s3, 4  ;;  %s26_s28 = int_to_ptr.vmem [resolvable:$true] %s25_s28  ;;  %s37_s8 = int_to_ptr.hbm [resolvable:$true] %s36_s8 }
   0x4   :  { %s1882_s9 = smov 128   ;;  %s1883_s10 = smov 8  }
   0x5   :  { %31 = dma.hbm_to_vmem [thread:$0]  %s24_s26, 8192, %s26_s28, [#allocation3], %s1882_s9, %s1882_s9, %s1883_s10  }
   0x6   :  { %s1884_s11 = smov [#allocation5]  }
   0x7   :  { %s38_s12 = sshll.u32 %s1884_s11, 4  ;;  %s39_s12 = int_to_ptr.vmem [resolvable:$true] %s38_s12 }
   0x8   :  { %44 = dma.hbm_to_vmem [thread:$0]  %s37_s8, 8192, %s39_s12, [#allocation6], %s1882_s9, %s1882_s9, %s1883_s10  }
   0x9   :  { %1875 = dma.done.wait [#allocation3], 8192  }
   0xa   :  { %1876 = vsyncadd [#allocation3], 4294959104 }
   0xb   :  { %1877 = dma.done.wait [#allocation6], 8192  }
   0xc   :  { %1878 = vsyncadd [#allocation6], 4294959104  ;;  %v1215_v0 = vld [vmem:[#allocation5 + $0x70] sm:$0xf]  ;;  %v1748_v1 = vld [vmem:[#allocation5 + $0x74] sm:$0xf0] }
   0xd   :  { %v1279_v2 = vld [vmem:[#allocation5 + $0xf0] sm:$0xf]  ;;  %v1216_v3 = vor.u32 %v1748_v1, %v1215_v0  ;;  %v1764_v4 = vld [vmem:[#allocation5 + $0xf4] sm:$0xf0]  ;;  %v1207_v11 = vld [vmem:[#allocation5 + $0x60] sm:$0xf] }
   0xe   :  { %v1343_v5 = vld [vmem:[#allocation5 + $0x170] sm:$0xf]  ;;  %v1780_v6 = vld [vmem:[#allocation5 + $0x174] sm:$0xf0]  ;;  %v1280_v7 = vor.u32 %v1764_v4, %v1279_v2  ;;  %v1746_v13 = vld [vmem:[#allocation5 + $0x64] sm:$0xf0] }
   0xf   :  { %v1344_v8 = vor.u32 %v1780_v6, %v1343_v5  ;;  %v1407_v9 = vld [vmem:[#allocation5 + $0x1f0] sm:$0xf]  ;;  %v1796_v10 = vld [vmem:[#allocation5 + $0x1f4] sm:$0xf0]  ;;  %523 = vmatpush.bf16.msra.mxu0 %v1216_v3  ;;  %v1271_v14 = vld [vmem:[#allocation5 + $0xe0] sm:$0xf]  ;;  %v1208_v16 = vor.u32 %v1746_v13, %v1207_v11 }
  0x10   :  { %v1408_v12 = vor.u32 %v1796_v10, %v1407_v9  ;;  %v1762_v15 = vld [vmem:[#allocation5 + $0xe4] sm:$0xf0]  ;;  %536 = vmatpush.bf16.msra.mxu1 %v1280_v7  ;;  %v1335_v18 = vld [vmem:[#allocation5 + $0x160] sm:$0xf]  ;;  %v1199_v23 = vld [vmem:[#allocation5 + $0x50] sm:$0xf] }
  0x11   :  { %549 = vmatpush.bf16.msra.mxu2 %v1344_v8  ;;  %v1272_v17 = vor.u32 %v1762_v15, %v1271_v14  ;;  %v1778_v19 = vld [vmem:[#allocation5 + $0x164] sm:$0xf0]  ;;  %v1399_v20 = vld [vmem:[#allocation5 + $0x1e0] sm:$0xf]  ;;  %v1744_v24 = vld [vmem:[#allocation5 + $0x54] sm:$0xf0] }
  0x12   :  { %562 = vmatpush.bf16.msra.mxu3 %v1408_v12  ;;  %v1336_v21 = vor.u32 %v1778_v19, %v1335_v18  ;;  %v1794_v22 = vld [vmem:[#allocation5 + $0x1e4] sm:$0xf0]  ;;  %v1263_v26 = vld [vmem:[#allocation5 + $0xd0] sm:$0xf]  ;;  %v1760_v27 = vld [vmem:[#allocation5 + $0xd4] sm:$0xf0]  ;;  %v1200_v29 = vor.u32 %v1744_v24, %v1199_v23 }
  0x13   :  { %v1400_v25 = vor.u32 %v1794_v22, %v1399_v20  ;;  %v1327_v28 = vld [vmem:[#allocation5 + $0x150] sm:$0xf]  ;;  %524 = vmatpush.bf16.msra.mxu0 %v1208_v16  ;;  %v1776_v30 = vld [vmem:[#allocation5 + $0x154] sm:$0xf0]  ;;  %v1264_v33 = vor.u32 %v1760_v27, %v1263_v26  ;;  %v1191_v35 = vld [vmem:[#allocation5 + $0x40] sm:$0xf] }
  0x14   :  { %v1391_v31 = vld [vmem:[#allocation5 + $0x1d0] sm:$0xf]  ;;  %v1792_v32 = vld [vmem:[#allocation5 + $0x1d4] sm:$0xf0]  ;;  %537 = vmatpush.bf16.msra.mxu1 %v1272_v17  ;;  %v1328_v34 = vor.u32 %v1776_v30, %v1327_v28  ;;  %v1742_v36 = vld [vmem:[#allocation5 + $0x44] sm:$0xf0] }
  0x15   :  { %550 = vmatpush.bf16.msra.mxu2 %v1336_v21  ;;  %v1255_v37 = vld [vmem:[#allocation5 + $0xc0] sm:$0xf]  ;;  %v1392_v38 = vor.u32 %v1792_v32, %v1391_v31  ;;  %v1758_v39 = vld [vmem:[#allocation5 + $0xc4] sm:$0xf0]  ;;  %v1192_v44 = vor.u32 %v1742_v36, %v1191_v35  ;;  %v1183_v47 = vld [vmem:[#allocation5 + $0x30] sm:$0xf] }
  0x16   :  { %563 = vmatpush.bf16.msra.mxu3 %v1400_v25  ;;  %v1319_v40 = vld [vmem:[#allocation5 + $0x140] sm:$0xf]  ;;  %v1774_v41 = vld [vmem:[#allocation5 + $0x144] sm:$0xf0]  ;;  %v1256_v45 = vor.u32 %v1758_v39, %v1255_v37  ;;  %v1740_v48 = vld [vmem:[#allocation5 + $0x34] sm:$0xf0] }
  0x17   :  { %v1383_v42 = vld [vmem:[#allocation5 + $0x1c0] sm:$0xf]  ;;  %v1790_v43 = vld [vmem:[#allocation5 + $0x1c4] sm:$0xf0]  ;;  %525 = vmatpush.bf16.msra.mxu0 %v1200_v29  ;;  %v1320_v46 = vor.u32 %v1774_v41, %v1319_v40  ;;  %v1247_v49 = vld [vmem:[#allocation5 + $0xb0] sm:$0xf]  ;;  %v1184_v56 = vor.u32 %v1740_v48, %v1183_v47 }
  0x18   :  { %538 = vmatpush.bf16.msra.mxu1 %v1264_v33  ;;  %v1384_v50 = vor.u32 %v1790_v43, %v1383_v42  ;;  %v1756_v51 = vld [vmem:[#allocation5 + $0xb4] sm:$0xf0]  ;;  %v1311_v52 = vld [vmem:[#allocation5 + $0x130] sm:$0xf]  ;;  %v1175_v59 = vld [vmem:[#allocation5 + $0x20] sm:$0xf] }
  0x19   :  { %551 = vmatpush.bf16.msra.mxu2 %v1328_v34  ;;  %v1772_v53 = vld [vmem:[#allocation5 + $0x134] sm:$0xf0]  ;;  %v1375_v54 = vld [vmem:[#allocation5 + $0x1b0] sm:$0xf]  ;;  %v1248_v57 = vor.u32 %v1756_v51, %v1247_v49  ;;  %v1738_v60 = vld [vmem:[#allocation5 + $0x24] sm:$0xf0] }
  0x1a   :  { %564 = vmatpush.bf16.msra.mxu3 %v1392_v38  ;;  %v1788_v55 = vld [vmem:[#allocation5 + $0x1b4] sm:$0xf0]  ;;  %v1312_v58 = vor.u32 %v1772_v53, %v1311_v52  ;;  %v1239_v61 = vld [vmem:[#allocation5 + $0xa0] sm:$0xf]  ;;  %v1754_v63 = vld [vmem:[#allocation5 + $0xa4] sm:$0xf0]  ;;  %v1176_v4 = vor.u32 %v1738_v60, %v1175_v59 }
  0x1b   :  { %526 = vmatpush.bf16.msra.mxu0 %v1192_v44  ;;  %v1376_v62 = vor.u32 %v1788_v55, %v1375_v54  ;;  %v1303_v0 = vld [vmem:[#allocation5 + $0x120] sm:$0xf]  ;;  %v1770_v1 = vld [vmem:[#allocation5 + $0x124] sm:$0xf0]  ;;  %v1240_v5 = vor.u32 %v1754_v63, %v1239_v61  ;;  %v1167_v7 = vld [vmem:[#allocation5 + $0x10] sm:$0xf] }
  0x1c   :  { %539 = vmatpush.bf16.msra.mxu1 %v1256_v45  ;;  %v1367_v2 = vld [vmem:[#allocation5 + $0x1a0] sm:$0xf]  ;;  %v1786_v3 = vld [vmem:[#allocation5 + $0x1a4] sm:$0xf0]  ;;  %v1304_v6 = vor.u32 %v1770_v1, %v1303_v0  ;;  %v1736_v8 = vld [vmem:[#allocation5 + $0x14] sm:$0xf0] }
  0x1d   :  { %552 = vmatpush.bf16.msra.mxu2 %v1320_v46  ;;  %v1231_v9 = vld [vmem:[#allocation5 + $0x90] sm:$0xf]  ;;  %v1368_v10 = vor.u32 %v1786_v3, %v1367_v2  ;;  %v1752_v11 = vld [vmem:[#allocation5 + $0x94] sm:$0xf0]  ;;  %v1168_v16 = vor.u32 %v1736_v8, %v1167_v7  ;;  %v1159_v17 = vld [vmem:[#allocation5] sm:$0xf] }
  0x1e   :  { %565 = vmatpush.bf16.msra.mxu3 %v1384_v50  ;;  %v1295_v12 = vld [vmem:[#allocation5 + $0x110] sm:$0xf]  ;;  %v1768_v13 = vld [vmem:[#allocation5 + $0x114] sm:$0xf0]  ;;  %v1734_v18 = vld [vmem:[#allocation5 + $0x4] sm:$0xf0]  ;;  %v1232_v19 = vor.u32 %v1752_v11, %v1231_v9 }
  0x1f   :  { %527 = vmatpush.bf16.msra.mxu0 %v1184_v56  ;;  %v1359_v14 = vld [vmem:[#allocation5 + $0x190] sm:$0xf]  ;;  %v1784_v15 = vld [vmem:[#allocation5 + $0x194] sm:$0xf0]  ;;  %v1296_v20 = vor.u32 %v1768_v13, %v1295_v12  ;;  %v1223_v21 = vld [vmem:[#allocation5 + $0x80] sm:$0xf]  ;;  %v1160_v31 = vor.u32 %v1734_v18, %v1159_v17 }
  0x20   :  { %540 = vmatpush.bf16.msra.mxu1 %v1248_v57  ;;  %v1750_v22 = vld [vmem:[#allocation5 + $0x84] sm:$0xf0]  ;;  %v1287_v23 = vld [vmem:[#allocation5 + $0x100] sm:$0xf]  ;;  %v1360_v24 = vor.u32 %v1784_v15, %v1359_v14  ;;  %v1747_v28 = vld [vmem:[#allocation5 + $0x74] sm:$0xf] }
  0x21   :  { %553 = vmatpush.bf16.msra.mxu2 %v1312_v58  ;;  %v1766_v25 = vld [vmem:[#allocation5 + $0x104] sm:$0xf0]  ;;  %v1351_v26 = vld [vmem:[#allocation5 + $0x180] sm:$0xf]  ;;  %v1217_v29 = vld [vmem:[#allocation5 + $0x78] sm:$0xf0]  ;;  %v1224_v35 = vor.u32 %v1750_v22, %v1223_v21 }
  0x22   :  { %566 = vmatpush.bf16.msra.mxu3 %v1376_v62  ;;  %v1782_v27 = vld [vmem:[#allocation5 + $0x184] sm:$0xf0]  ;;  %v1763_v30 = vld [vmem:[#allocation5 + $0xf4] sm:$0xf]  ;;  %v1281_v32 = vld [vmem:[#allocation5 + $0xf8] sm:$0xf0]  ;;  %v1288_v36 = vor.u32 %v1766_v25, %v1287_v23  ;;  %v1220_v40 = vor.u32 %v1747_v28, %v1217_v29 }
  0x23   :  { %528 = vmatpush.bf16.msra.mxu0 %v1176_v4  ;;  %v1779_v33 = vld [vmem:[#allocation5 + $0x174] sm:$0xf]  ;;  %v1345_v34 = vld [vmem:[#allocation5 + $0x178] sm:$0xf0]  ;;  %v1352_v39 = vor.u32 %v1782_v27, %v1351_v26  ;;  %v1284_v41 = vor.u32 %v1763_v30, %v1281_v32  ;;  %v1745_v43 = vld [vmem:[#allocation5 + $0x64] sm:$0xf] }
  0x24   :  { %541 = vmatpush.bf16.msra.mxu1 %v1240_v5  ;;  %v1795_v37 = vld [vmem:[#allocation5 + $0x1f4] sm:$0xf]  ;;  %v1409_v38 = vld [vmem:[#allocation5 + $0x1f8] sm:$0xf0]  ;;  %v1348_v42 = vor.u32 %v1779_v33, %v1345_v34  ;;  %v1209_v44 = vld [vmem:[#allocation5 + $0x68] sm:$0xf0] }
  0x25   :  { %554 = vmatpush.bf16.msra.mxu2 %v1304_v6  ;;  %v1761_v45 = vld [vmem:[#allocation5 + $0xe4] sm:$0xf]  ;;  %v1412_v46 = vor.u32 %v1795_v37, %v1409_v38  ;;  %v1273_v47 = vld [vmem:[#allocation5 + $0xe8] sm:$0xf0]  ;;  %v1212_v52 = vor.u32 %v1745_v43, %v1209_v44  ;;  %v1743_v53 = vld [vmem:[#allocation5 + $0x54] sm:$0xf] }
  0x26   :  { %567 = vmatpush.bf16.msra.mxu3 %v1368_v10  ;;  %v1777_v48 = vld [vmem:[#allocation5 + $0x164] sm:$0xf]  ;;  %v1337_v49 = vld [vmem:[#allocation5 + $0x168] sm:$0xf0]  ;;  %v1276_v54 = vor.u32 %v1761_v45, %v1273_v47  ;;  %v1201_v56 = vld [vmem:[#allocation5 + $0x58] sm:$0xf0] }
  0x27   :  { %529 = vmatpush.bf16.msra.mxu0 %v1168_v16  ;;  %v1793_v50 = vld [vmem:[#allocation5 + $0x1e4] sm:$0xf]  ;;  %v1401_v51 = vld [vmem:[#allocation5 + $0x1e8] sm:$0xf0]  ;;  %v1340_v55 = vor.u32 %v1777_v48, %v1337_v49  ;;  %v1759_v57 = vld [vmem:[#allocation5 + $0xd4] sm:$0xf]  ;;  %v1204_v0 = vor.u32 %v1743_v53, %v1201_v56 }
  0x28   :  { %542 = vmatpush.bf16.msra.mxu1 %v1232_v19  ;;  %v1265_v58 = vld [vmem:[#allocation5 + $0xd8] sm:$0xf0]  ;;  %v1404_v59 = vor.u32 %v1793_v50, %v1401_v51  ;;  %v1775_v60 = vld [vmem:[#allocation5 + $0x154] sm:$0xf]  ;;  %v1741_v2 = vld [vmem:[#allocation5 + $0x44] sm:$0xf] }
  0x29   :  { %555 = vmatpush.bf16.msra.mxu2 %v1296_v20  ;;  %v1329_v61 = vld [vmem:[#allocation5 + $0x158] sm:$0xf0]  ;;  %v1791_v62 = vld [vmem:[#allocation5 + $0x1d4] sm:$0xf]  ;;  %v1268_v1 = vor.u32 %v1759_v57, %v1265_v58  ;;  %v67_v4 = vld [vmem:[%s2106_s1] sm:$0xff]  ;;  %s1885_s3 = smov [#allocation7]  }
  0x2a   :  { %568 = vmatpush.bf16.msra.mxu3 %v1360_v24  ;;  %v1393_v63 = vld [vmem:[#allocation5 + $0x1d8] sm:$0xf0]  ;;  %v69_v3 = vld [vmem:[%s2106_s1 + $0x10] sm:$0xff]  ;;  %v1332_v5 = vor.u32 %v1775_v60, %v1329_v61  ;;  %v1193_v6 = vld [vmem:[#allocation5 + $0x48] sm:$0xf0]  ;;  %v1940_v9 = vpack.c.bf16 %v67_v4, %v67_v4  ;;  %s1144_s13 = sshll.u32 %s1885_s3, 4  ;;  %s1145_s13 = int_to_ptr.vmem [resolvable:$true] %s1144_s13 }
  0x2b   :  { %530 = vmatpush.bf16.msra.mxu0 %v1160_v31  ;;  %v1757_v7 = vld [vmem:[#allocation5 + $0xc4] sm:$0xf]  ;;  %v1938_v8 = vpack.c.bf16 %v69_v3, %v69_v3  ;;  %v70_v10 = vld [vmem:[%s2106_s1 + $0x18] sm:$0xff]  ;;  %v1396_v11 = vor.u32 %v1791_v62, %v1393_v63  ;;  %v1257_v12 = vld [vmem:[#allocation5 + $0xc8] sm:$0xf0]  ;;  %v1196_v18 = vor.u32 %v1741_v2, %v1193_v6  ;;  %s1146_s16 = sshll.u32 %s2112_s7, 4  ;;  %s1147_s16 = int_to_ptr.hbm [resolvable:$true] %s1146_s16 }
  0x2c   :  { %543 = vmatpush.bf16.msra.mxu1 %v1224_v35  ;;  %v1773_v13 = vld [vmem:[#allocation5 + $0x144] sm:$0xf]  ;;  %v1321_v14 = vld [vmem:[#allocation5 + $0x148] sm:$0xf0]  ;;  %v1945_v15 = vpack.c.bf16 %v70_v10, %v70_v10  ;;  %v1260_v20 = vor.u32 %v1757_v7, %v1257_v12  ;;  %v1739_v22 = vld [vmem:[#allocation5 + $0x34] sm:$0xf] }
  0x2d   :  { %556 = vmatpush.bf16.msra.mxu2 %v1288_v36  ;;  %v1789_v16 = vld [vmem:[#allocation5 + $0x1c4] sm:$0xf]  ;;  %v1385_v17 = vld [vmem:[#allocation5 + $0x1c8] sm:$0xf0]  ;;  %v1324_v21 = vor.u32 %v1773_v13, %v1321_v14  ;;  %v1185_v23 = vld [vmem:[#allocation5 + $0x38] sm:$0xf0] }
  0x2e   :  { %569 = vmatpush.bf16.msra.mxu3 %v1352_v39  ;;  %531 = vmatmul.bf16.vlgmr.msra.gmra.mxu0 %v1940_v9  ;;  %v68_v19 = vld [vmem:[%s2106_s1 + $0x8] sm:$0xff]  ;;  %v1755_v24 = vld [vmem:[#allocation5 + $0xb4] sm:$0xf]  ;;  %v1388_v26 = vor.u32 %v1789_v16, %v1385_v17  ;;  %v1249_v27 = vld [vmem:[#allocation5 + $0xb8] sm:$0xf0]  ;;  %v1188_v32 = vor.u32 %v1739_v22, %v1185_v23  ;;  %vm1137_vm0 = vcmask 64512  }
  0x2f   :  { %575 = vmatpush.bf16.msrb.mxu0 %v1220_v40  ;;  %v1953_v25 = vpack.c.bf16 %v68_v19, %v68_v19  ;;  %v1771_v28 = vld [vmem:[#allocation5 + $0x134] sm:$0xf]  ;;  %v1313_v29 = vld [vmem:[#allocation5 + $0x138] sm:$0xf0]  ;;  %v1252_v33 = vor.u32 %v1755_v24, %v1249_v27  ;;  %v1737_v35 = vld [vmem:[#allocation5 + $0x24] sm:$0xf] }
  0x30   :  { %588 = vmatpush.bf16.msrb.mxu1 %v1284_v41  ;;  %557 = vmatmul.bf16.vlgmr.msra.gmra.mxu2 %v1938_v8  ;;  %v1787_v30 = vld [vmem:[#allocation5 + $0x1b4] sm:$0xf]  ;;  %v1377_v31 = vld [vmem:[#allocation5 + $0x1b8] sm:$0xf0]  ;;  %v1316_v34 = vor.u32 %v1771_v28, %v1313_v29  ;;  %v1177_v36 = vld [vmem:[#allocation5 + $0x28] sm:$0xf0] }
  0x31   :  { %601 = vmatpush.bf16.msrb.mxu2 %v1348_v42  ;;  %570 = vmatmul.bf16.vlgmr.msra.gmra.mxu3 %v1945_v15  ;;  %v1753_v37 = vld [vmem:[#allocation5 + $0xa4] sm:$0xf]  ;;  %v1380_v38 = vor.u32 %v1787_v30, %v1377_v31  ;;  %v1241_v39 = vld [vmem:[#allocation5 + $0xa8] sm:$0xf0]  ;;  %v1180_v44 = vor.u32 %v1737_v35, %v1177_v36  ;;  %v1735_v47 = vld [vmem:[#allocation5 + $0x14] sm:$0xf] }
  0x32   :  { %614 = vmatpush.bf16.msrb.mxu3 %v1412_v46  ;;  %544 = vmatmul.bf16.vlgmr.msra.gmra.mxu1 %v1953_v25  ;;  %v1769_v40 = vld [vmem:[#allocation5 + $0x124] sm:$0xf]  ;;  %v1305_v41 = vld [vmem:[#allocation5 + $0x128] sm:$0xf0]  ;;  %v1244_v45 = vor.u32 %v1753_v37, %v1241_v39  ;;  %v1169_v48 = vld [vmem:[#allocation5 + $0x18] sm:$0xf0] }
  0x33   :  { %576 = vmatpush.bf16.msrb.mxu0 %v1212_v52  ;;  %v1785_v42 = vld [vmem:[#allocation5 + $0x1a4] sm:$0xf]  ;;  %v1369_v43 = vld [vmem:[#allocation5 + $0x1a8] sm:$0xf0]  ;;  %v1308_v46 = vor.u32 %v1769_v40, %v1305_v41  ;;  %v1751_v49 = vld [vmem:[#allocation5 + $0x94] sm:$0xf]  ;;  %v1172_v56 = vor.u32 %v1735_v47, %v1169_v48 }
  0x34   :  { %589 = vmatpush.bf16.msrb.mxu1 %v1276_v54  ;;  %v1372_v50 = vor.u32 %v1785_v42, %v1369_v43  ;;  %v1233_v51 = vld [vmem:[#allocation5 + $0x98] sm:$0xf0]  ;;  %v1767_v52 = vld [vmem:[#allocation5 + $0x114] sm:$0xf]  ;;  %v1733_v57 = vld [vmem:[#allocation5 + $0x4] sm:$0xf] }
  0x35   :  { %602 = vmatpush.bf16.msrb.mxu2 %v1340_v55  ;;  %v1297_v53 = vld [vmem:[#allocation5 + $0x118] sm:$0xf0]  ;;  %v1783_v54 = vld [vmem:[#allocation5 + $0x194] sm:$0xf]  ;;  %v1161_v58 = vld [vmem:[#allocation5 + $0x8] sm:$0xf0] }
  0x36   :  { %615 = vmatpush.bf16.msrb.mxu3 %v1404_v59  ;;  %v1361_v55 = vld [vmem:[#allocation5 + $0x198] sm:$0xf0]  ;;  %v1236_v59 = vor.u32 %v1751_v49, %v1233_v51  ;;  %v1300_v60 = vor.u32 %v1767_v52, %v1297_v53  ;;  %v1749_v61 = vld [vmem:[#allocation5 + $0x84] sm:$0xf]  ;;  %v1225_v62 = vld [vmem:[#allocation5 + $0x88] sm:$0xf0]  ;;  %v1164_v7 = vor.u32 %v1733_v57, %v1161_v58 }
  0x37   :  { %577 = vmatpush.bf16.msrb.mxu0 %v1204_v0  ;;  %v1765_v63 = vld [vmem:[#allocation5 + $0x104] sm:$0xf]  ;;  %v1364_v0 = vor.u32 %v1783_v54, %v1361_v55  ;;  %v1353_v3 = vld [vmem:[#allocation5 + $0x188] sm:$0xf0]  ;;  %v1471_v4 = vld [vmem:[#allocation2 + $0x70] sm:$0xf]  ;;  %v1228_v13 = vor.u32 %v1749_v61, %v1225_v62 }
  0x38   :  { %590 = vmatpush.bf16.msrb.mxu1 %v1268_v1  ;;  %v1289_v1 = vld [vmem:[#allocation5 + $0x108] sm:$0xf0]  ;;  %v1781_v2 = vld [vmem:[#allocation5 + $0x184] sm:$0xf]  ;;  %v1535_v6 = vld [vmem:[#allocation2 + $0xf0] sm:$0xf] }
  0x39   :  { %603 = vmatpush.bf16.msrb.mxu2 %v1332_v5  ;;  %v1684_v5 = vld [vmem:[#allocation2 + $0x74] sm:$0xf0]  ;;  %v1292_v14 = vor.u32 %v1765_v63, %v1289_v1  ;;  %v1663_v16 = vld [vmem:[#allocation2 + $0x1f0] sm:$0xf]  ;;  %v1463_v22 = vld [vmem:[#allocation2 + $0x60] sm:$0xf] }
  0x3a   :  { %616 = vmatpush.bf16.msrb.mxu3 %v1396_v11  ;;  %v1700_v10 = vld [vmem:[#allocation2 + $0xf4] sm:$0xf0]  ;;  %v1599_v11 = vld [vmem:[#allocation2 + $0x170] sm:$0xf]  ;;  %v1472_v19 = vor.u32 %v1684_v5, %v1471_v4  ;;  %v1682_v23 = vld [vmem:[#allocation2 + $0x64] sm:$0xf0] }
  0x3b   :  { %578 = vmatpush.bf16.msrb.mxu0 %v1196_v18  ;;  %v1716_v12 = vld [vmem:[#allocation2 + $0x174] sm:$0xf0]  ;;  %v1356_v18 = vor.u32 %v1781_v2, %v1353_v3  ;;  %v1527_v24 = vld [vmem:[#allocation2 + $0xe0] sm:$0xf]  ;;  %v1698_v27 = vld [vmem:[#allocation2 + $0xe4] sm:$0xf0] }
  0x3c   :  { %591 = vmatpush.bf16.msrb.mxu1 %v1260_v20  ;;  %v1732_v17 = vld [vmem:[#allocation2 + $0x1f4] sm:$0xf0]  ;;  %v1536_v20 = vor.u32 %v1700_v10, %v1535_v6  ;;  %v1591_v28 = vld [vmem:[#allocation2 + $0x160] sm:$0xf]  ;;  %v1714_v29 = vld [vmem:[#allocation2 + $0x164] sm:$0xf0] }
  0x3d   :  { %604 = vmatpush.bf16.msrb.mxu2 %v1324_v21  ;;  %v1600_v21 = vor.u32 %v1716_v12, %v1599_v11  ;;  %v1655_v30 = vld [vmem:[#allocation2 + $0x1e0] sm:$0xf]  ;;  %v1730_v31 = vld [vmem:[#allocation2 + $0x1e4] sm:$0xf0]  ;;  %v1455_v35 = vld [vmem:[#allocation2 + $0x50] sm:$0xf] }
  0x3e   :  { %617 = vmatpush.bf16.msrb.mxu3 %v1388_v26  ;;  %v1664_v26 = vor.u32 %v1732_v17, %v1663_v16  ;;  %v1680_v36 = vld [vmem:[#allocation2 + $0x54] sm:$0xf0]  ;;  %v1519_v37 = vld [vmem:[#allocation2 + $0xd0] sm:$0xf]  ;;  %v1447_v47 = vld [vmem:[#allocation2 + $0x40] sm:$0xf] }
  0x3f   :  { %579 = vmatpush.bf16.msrb.mxu0 %v1188_v32  ;;  %v1464_v32 = vor.u32 %v1682_v23, %v1463_v22  ;;  %v1696_v39 = vld [vmem:[#allocation2 + $0xd4] sm:$0xf0]  ;;  %v1583_v40 = vld [vmem:[#allocation2 + $0x150] sm:$0xf]  ;;  %v1678_v48 = vld [vmem:[#allocation2 + $0x44] sm:$0xf0] }
  0x40   :  { %592 = vmatpush.bf16.msrb.mxu1 %v1252_v33  ;;  %v1528_v33 = vor.u32 %v1698_v27, %v1527_v24  ;;  %v1712_v41 = vld [vmem:[#allocation2 + $0x154] sm:$0xf0]  ;;  %v1647_v42 = vld [vmem:[#allocation2 + $0x1d0] sm:$0xf]  ;;  %v1511_v49 = vld [vmem:[#allocation2 + $0xc0] sm:$0xf] }
  0x41   :  { %605 = vmatpush.bf16.msrb.mxu2 %v1316_v34  ;;  %v1592_v34 = vor.u32 %v1714_v29, %v1591_v28  ;;  %v1728_v43 = vld [vmem:[#allocation2 + $0x1d4] sm:$0xf0]  ;;  %v1575_v51 = vld [vmem:[#allocation2 + $0x140] sm:$0xf]  ;;  %v1710_v52 = vld [vmem:[#allocation2 + $0x144] sm:$0xf0] }
  0x42   :  { %618 = vmatpush.bf16.msrb.mxu3 %v1380_v38  ;;  %v1656_v38 = vor.u32 %v1730_v31, %v1655_v30  ;;  %v1639_v53 = vld [vmem:[#allocation2 + $0x1c0] sm:$0xf]  ;;  %v1439_v55 = vld [vmem:[#allocation2 + $0x30] sm:$0xf]  ;;  %v1708_v61 = vld [vmem:[#allocation2 + $0x134] sm:$0xf0] }
  0x43   :  { %580 = vmatpush.bf16.msrb.mxu0 %v1180_v44  ;;  %v1456_v44 = vor.u32 %v1680_v36, %v1455_v35  ;;  %v1503_v57 = vld [vmem:[#allocation2 + $0xb0] sm:$0xf]  ;;  %v1724_v63 = vld [vmem:[#allocation2 + $0x1b4] sm:$0xf0]  ;;  %v1431_v3 = vld [vmem:[#allocation2 + $0x20] sm:$0xf] }
  0x44   :  { %593 = vmatpush.bf16.msrb.mxu1 %v1244_v45  ;;  %v1520_v45 = vor.u32 %v1696_v39, %v1519_v37  ;;  %v1631_v62 = vld [vmem:[#allocation2 + $0x1b0] sm:$0xf]  ;;  %v1674_v4 = vld [vmem:[#allocation2 + $0x24] sm:$0xf0]  ;;  %v1495_v5 = vld [vmem:[#allocation2 + $0xa0] sm:$0xf] }
  0x45   :  { %606 = vmatpush.bf16.msrb.mxu2 %v1308_v46  ;;  %v1584_v46 = vor.u32 %v1712_v41, %v1583_v40  ;;  %v1632_v6 = vor.u32 %v1724_v63, %v1631_v62  ;;  %v1559_v10 = vld [vmem:[#allocation2 + $0x120] sm:$0xf]  ;;  %v1706_v11 = vld [vmem:[#allocation2 + $0x124] sm:$0xf0]  ;;  %v1688_v22 = vld [vmem:[#allocation2 + $0x94] sm:$0xf0] }
  0x46   :  { %619 = vmatpush.bf16.msrb.mxu3 %v1372_v50  ;;  %v1648_v50 = vor.u32 %v1728_v43, %v1647_v42  ;;  %v1623_v12 = vld [vmem:[#allocation2 + $0x1a0] sm:$0xf]  ;;  %v1560_v17 = vor.u32 %v1706_v11, %v1559_v10  ;;  %v1551_v23 = vld [vmem:[#allocation2 + $0x110] sm:$0xf]  ;;  %v1704_v24 = vld [vmem:[#allocation2 + $0x114] sm:$0xf0] }
  0x47   :  { %581 = vmatpush.bf16.msrb.mxu0 %v1172_v56  ;;  %v1676_v56 = vld [vmem:[#allocation2 + $0x34] sm:$0xf0]  ;;  %v1415_v29 = vld [vmem:[#allocation2] sm:$0xf]  ;;  %v1670_v30 = vld [vmem:[#allocation2 + $0x4] sm:$0xf0] }
  0x48   :  { %594 = vmatpush.bf16.msrb.mxu1 %v1236_v59  ;;  %v1692_v59 = vld [vmem:[#allocation2 + $0xb4] sm:$0xf0]  ;;  %v1543_v35 = vld [vmem:[#allocation2 + $0x100] sm:$0xf]  ;;  %v1702_v37 = vld [vmem:[#allocation2 + $0x104] sm:$0xf0]  ;;  %v1416_v43 = vor.u32 %v1670_v30, %v1415_v29 }
  0x49   :  { %607 = vmatpush.bf16.msrb.mxu2 %v1300_v60  ;;  %v1567_v60 = vld [vmem:[#allocation2 + $0x130] sm:$0xf]  ;;  %v1504_v1 = vor.u32 %v1692_v59, %v1503_v57  ;;  %v1720_v27 = vld [vmem:[#allocation2 + $0x194] sm:$0xf0]  ;;  %v1718_v39 = vld [vmem:[#allocation2 + $0x184] sm:$0xf0] }
  0x4a   :  { %620 = vmatpush.bf16.msrb.mxu3 %v1364_v0  ;;  %v1440_v0 = vor.u32 %v1676_v56, %v1439_v55  ;;  %v1568_v2 = vor.u32 %v1708_v61, %v1567_v60  ;;  %v1683_v40 = vld [vmem:[#allocation2 + $0x74] sm:$0xf]  ;;  %v1473_v41 = vld [vmem:[#allocation2 + $0x78] sm:$0xf0]  ;;  %v1681_v55 = vld [vmem:[#allocation2 + $0x64] sm:$0xf] }
  0x4b   :  { %582 = vmatpush.bf16.msrb.mxu0 %v1164_v7  ;;  %v1690_v7 = vld [vmem:[#allocation2 + $0xa4] sm:$0xf0]  ;;  %v1699_v42 = vld [vmem:[#allocation2 + $0xf4] sm:$0xf]  ;;  %v1465_v56 = vld [vmem:[#allocation2 + $0x68] sm:$0xf0] }
  0x4c   :  { %595 = vmatpush.bf16.msrb.mxu1 %v1228_v13  ;;  %v1722_v13 = vld [vmem:[#allocation2 + $0x1a4] sm:$0xf0]  ;;  %v1496_v16 = vor.u32 %v1690_v7, %v1495_v5  ;;  %v1697_v57 = vld [vmem:[#allocation2 + $0xe4] sm:$0xf]  ;;  %v1529_v60 = vld [vmem:[#allocation2 + $0xe8] sm:$0xf0] }
  0x4d   :  { %608 = vmatpush.bf16.msrb.mxu2 %v1292_v14  ;;  %v1432_v14 = vor.u32 %v1674_v4, %v1431_v3  ;;  %v1713_v61 = vld [vmem:[#allocation2 + $0x164] sm:$0xf]  ;;  %v1593_v62 = vld [vmem:[#allocation2 + $0x168] sm:$0xf0]  ;;  %v1468_v4 = vor.u32 %v1681_v55, %v1465_v56  ;;  %v1532_v5 = vor.u32 %v1697_v57, %v1529_v60  ;;  %v1679_v7 = vld [vmem:[#allocation2 + $0x54] sm:$0xf] }
  0x4e   :  { %621 = vmatpush.bf16.msrb.mxu3 %v1356_v18  ;;  %583 = vmatmul.bf16.vlgmr.msrb.gmra.mxu0 %v1940_v9  ;;  %v1694_v9 = vld [vmem:[#allocation2 + $0xc4] sm:$0xf0]  ;;  %v1423_v18 = vld [vmem:[#allocation2 + $0x10] sm:$0xf]  ;;  %v1457_v10 = vld [vmem:[#allocation2 + $0x58] sm:$0xf0] }
  0x4f   :  { %947 = vmatpush.bf16.msra.mxu0 %v1472_v19  ;;  %596 = vmatmul.bf16.vlgmr.msrb.gmra.mxu1 %v1953_v25  ;;  %v1448_v25 = vor.u32 %v1678_v48, %v1447_v47  ;;  %v1512_v54 = vor.u32 %v1694_v9, %v1511_v49  ;;  %v1672_v19 = vld [vmem:[#allocation2 + $0x14] sm:$0xf0]  ;;  %v1544_v48 = vor.u32 %v1702_v37, %v1543_v35  ;;  %v1731_v49 = vld [vmem:[#allocation2 + $0x1f4] sm:$0xf]  ;;  %v59_v9 = vld [vmem:[%s2105_s0] sm:$0xff] }
  0x50   :  { %960 = vmatpush.bf16.msra.mxu1 %v1536_v20  ;;  %609 = vmatmul.bf16.vlgmr.msrb.gmra.mxu2 %v1938_v8  ;;  %v1726_v8 = vld [vmem:[#allocation2 + $0x1c4] sm:$0xf0]  ;;  %v1487_v20 = vld [vmem:[#allocation2 + $0x90] sm:$0xf]  ;;  %v1424_v28 = vor.u32 %v1672_v19, %v1423_v18  ;;  %v1972_v59 = vpack.c.bf16 %v59_v9, %v59_v9  ;;  %v1695_v11 = vld [vmem:[#allocation2 + $0xd4] sm:$0xf]  ;;  %v1460_v19 = vor.u32 %v1679_v7, %v1457_v10 }
  0x51   :  { %973 = vmatpush.bf16.msra.mxu2 %v1600_v21  ;;  %622 = vmatmul.bf16.vlgmr.msrb.gmra.mxu3 %v1945_v15  ;;  %v1576_v15 = vor.u32 %v1710_v52, %v1575_v51  ;;  %v1640_v58 = vor.u32 %v1726_v8, %v1639_v53  ;;  %v1624_v21 = vor.u32 %v1722_v13, %v1623_v12  ;;  %v61_v53 = vld [vmem:[%s2105_s0 + $0x10] sm:$0xff]  ;;  %v60_v8 = vld [vmem:[%s2105_s0 + $0x8] sm:$0xff]  ;;  %v1521_v13 = vld [vmem:[#allocation2 + $0xd8] sm:$0xf0] }
  0x52   :  { %986 = vmatpush.bf16.msra.mxu3 %v1664_v26  ;;  %v1615_v26 = vld [vmem:[#allocation2 + $0x190] sm:$0xf]  ;;  %v1488_v31 = vor.u32 %v1688_v22, %v1487_v20  ;;  %v1476_v52 = vor.u32 %v1683_v40, %v1473_v41  ;;  %v1974_v63 = vpack.c.bf16 %v61_v53, %v61_v53  ;;  %v1649_v18 = vld [vmem:[#allocation2 + $0x1d8] sm:$0xf0]  ;;  %v1524_v20 = vor.u32 %v1695_v11, %v1521_v13  ;;  %v1677_v22 = vld [vmem:[#allocation2 + $0x44] sm:$0xf] }
  0x53   :  { %948 = vmatpush.bf16.msra.mxu0 %v1464_v32  ;;  %v1552_v32 = vor.u32 %v1704_v24, %v1551_v23  ;;  %v1616_v36 = vor.u32 %v1720_v27, %v1615_v26  ;;  %v1449_v23 = vld [vmem:[#allocation2 + $0x48] sm:$0xf0]  ;;  %v1693_v24 = vld [vmem:[#allocation2 + $0xc4] sm:$0xf]  ;;  %v1675_v35 = vld [vmem:[#allocation2 + $0x34] sm:$0xf] }
  0x54   :  { %961 = vmatpush.bf16.msra.mxu1 %v1528_v33  ;;  %v1479_v33 = vld [vmem:[#allocation2 + $0x80] sm:$0xf]  ;;  %v1513_v27 = vld [vmem:[#allocation2 + $0xc8] sm:$0xf0]  ;;  %v1725_v30 = vld [vmem:[#allocation2 + $0x1c4] sm:$0xf] }
  0x55   :  { %974 = vmatpush.bf16.msra.mxu2 %v1592_v34  ;;  %v1686_v34 = vld [vmem:[#allocation2 + $0x84] sm:$0xf0]  ;;  %v1577_v29 = vld [vmem:[#allocation2 + $0x148] sm:$0xf0]  ;;  %v1691_v37 = vld [vmem:[#allocation2 + $0xb4] sm:$0xf] }
  0x56   :  { %987 = vmatpush.bf16.msra.mxu3 %v1656_v38  ;;  %v1607_v38 = vld [vmem:[#allocation2 + $0x180] sm:$0xf]  ;;  %v1480_v47 = vor.u32 %v1686_v34, %v1479_v33  ;;  %v1516_v33 = vor.u32 %v1693_v24, %v1513_v27  ;;  %v1707_v40 = vld [vmem:[#allocation2 + $0x134] sm:$0xf]  ;;  %v1569_v41 = vld [vmem:[#allocation2 + $0x138] sm:$0xf0] }
  0x57   :  { %949 = vmatpush.bf16.msra.mxu0 %v1456_v44  ;;  %v1537_v44 = vld [vmem:[#allocation2 + $0xf8] sm:$0xf0]  ;;  %v1608_v51 = vor.u32 %v1718_v39, %v1607_v38  ;;  %v1497_v9 = vld [vmem:[#allocation2 + $0xa8] sm:$0xf0]  ;;  %v1721_v53 = vld [vmem:[#allocation2 + $0x1a4] sm:$0xf] }
  0x58   :  { %962 = vmatpush.bf16.msra.mxu1 %v1520_v45  ;;  %v1715_v45 = vld [vmem:[#allocation2 + $0x174] sm:$0xf]  ;;  %v1505_v39 = vld [vmem:[#allocation2 + $0xb8] sm:$0xf0]  ;;  %v1669_v7 = vld [vmem:[#allocation2 + $0x4] sm:$0xf] }
  0x59   :  { %975 = vmatpush.bf16.msra.mxu2 %v1584_v46  ;;  %v1601_v46 = vld [vmem:[#allocation2 + $0x178] sm:$0xf0]  ;;  %v1671_v55 = vld [vmem:[#allocation2 + $0x14] sm:$0xf]  ;;  %v1417_v10 = vld [vmem:[#allocation2 + $0x8] sm:$0xf0] }
  0x5a   :  { %988 = vmatpush.bf16.msra.mxu3 %v1648_v50  ;;  %v1665_v50 = vld [vmem:[#allocation2 + $0x1f8] sm:$0xf0]  ;;  %v1687_v57 = vld [vmem:[#allocation2 + $0x94] sm:$0xf]  ;;  %v1685_v11 = vld [vmem:[#allocation2 + $0x84] sm:$0xf] }
  0x5b   :  { %950 = vmatpush.bf16.msra.mxu0 %v1448_v25  ;;  %v62_v25 = vld [vmem:[%s2105_s0 + $0x18] sm:$0xff]  ;;  %v1481_v13 = vld [vmem:[#allocation2 + $0x88] sm:$0xf0]  ;;  %v1075_v24 = vld [vmem:[%s2110_s5 + $0x70] sm:$0xff] }
  0x5c   :  { %963 = vmatpush.bf16.msra.mxu1 %v1512_v54  ;;  %v1540_v54 = vor.u32 %v1699_v42, %v1537_v44  ;;  %v1978_v3 = vpack.c.bf16 %v62_v25, %v62_v25  ;;  %v1723_v42 = vld [vmem:[#allocation2 + $0x1b4] sm:$0xf]  ;;  %v1425_v56 = vld [vmem:[#allocation2 + $0x18] sm:$0xf0] }
  0x5d   :  { %976 = vmatpush.bf16.msra.mxu2 %v1576_v15  ;;  %v1604_v15 = vor.u32 %v1715_v45, %v1601_v46  ;;  %v1508_v45 = vor.u32 %v1691_v37, %v1505_v39  ;;  %v1572_v46 = vor.u32 %v1707_v40, %v1569_v41  ;;  %v1489_v60 = vld [vmem:[#allocation2 + $0x98] sm:$0xf0]  ;;  %v1067_v39 = vld [vmem:[%s2110_s5 + $0x30] sm:$0xff]  ;;  %v1066_v40 = vld [vmem:[%s2110_s5 + $0x28] sm:$0xff] }
  0x5e   :  { %989 = vmatpush.bf16.msra.mxu3 %v1640_v58  ;;  %v1668_v58 = vor.u32 %v1731_v49, %v1665_v50  ;;  %v1689_v49 = vld [vmem:[#allocation2 + $0xa4] sm:$0xf] }
  0x5f   :  { %951 = vmatpush.bf16.msra.mxu0 %v1440_v0  ;;  %v1976_v0 = vpack.c.bf16 %v60_v8, %v60_v8  ;;  %v1625_v8 = vld [vmem:[#allocation2 + $0x1a8] sm:$0xf0]  ;;  %v1065_v41 = vld [vmem:[%s2110_s5 + $0x20] sm:$0xff] }
  0x60   :  { %964 = vmatpush.bf16.msra.mxu1 %v1504_v1  ;;  %v1729_v1 = vld [vmem:[#allocation2 + $0x1e4] sm:$0xf] }
  0x61   :  { %977 = vmatpush.bf16.msra.mxu2 %v1568_v2  ;;  %v1657_v2 = vld [vmem:[#allocation2 + $0x1e8] sm:$0xf0] }
  0x62   :  { %990 = vmatpush.bf16.msra.mxu3 %v1632_v6  ;;  %v1596_v6 = vor.u32 %v1713_v61, %v1593_v62  ;;  %v1660_v12 = vor.u32 %v1729_v1, %v1657_v2  ;;  %v1703_v61 = vld [vmem:[#allocation2 + $0x114] sm:$0xf]  ;;  %v1553_v62 = vld [vmem:[#allocation2 + $0x118] sm:$0xf0] }
  0x63   :  { %952 = vmatpush.bf16.msra.mxu0 %v1432_v14  ;;  %v1711_v14 = vld [vmem:[#allocation2 + $0x154] sm:$0xf]  ;;  %v1617_v2 = vld [vmem:[#allocation2 + $0x198] sm:$0xf0] }
  0x64   :  { %965 = vmatpush.bf16.msra.mxu1 %v1496_v16  ;;  %v1585_v16 = vld [vmem:[#allocation2 + $0x158] sm:$0xf0]  ;;  %v1719_v1 = vld [vmem:[#allocation2 + $0x194] sm:$0xf] }
  0x65   :  { %978 = vmatpush.bf16.msra.mxu2 %v1560_v17  ;;  %v1727_v17 = vld [vmem:[#allocation2 + $0x1d4] sm:$0xf] }
  0x66   :  { %991 = vmatpush.bf16.msra.mxu3 %v1624_v21  ;;  %v1588_v21 = vor.u32 %v1711_v14, %v1585_v16  ;;  %v1652_v26 = vor.u32 %v1727_v17, %v1649_v18  ;;  %v1701_v14 = vld [vmem:[#allocation2 + $0x104] sm:$0xf]  ;;  %v1545_v16 = vld [vmem:[#allocation2 + $0x108] sm:$0xf0] }
  0x67   :  { %953 = vmatpush.bf16.msra.mxu0 %v1424_v28  ;;  %v1709_v28 = vld [vmem:[#allocation2 + $0x144] sm:$0xf]  ;;  %v1609_v18 = vld [vmem:[#allocation2 + $0x188] sm:$0xf0] }
  0x68   :  { %966 = vmatpush.bf16.msra.mxu1 %v1488_v31  ;;  %v1641_v31 = vld [vmem:[#allocation2 + $0x1c8] sm:$0xf0]  ;;  %v1580_v34 = vor.u32 %v1709_v28, %v1577_v29  ;;  %v1717_v17 = vld [vmem:[#allocation2 + $0x184] sm:$0xf] }
  0x69   :  { %979 = vmatpush.bf16.msra.mxu2 %v1552_v32  ;;  %v1452_v32 = vor.u32 %v1677_v22, %v1449_v23  ;;  %v1644_v38 = vor.u32 %v1725_v30, %v1641_v31  ;;  %v1612_v22 = vor.u32 %v1717_v17, %v1609_v18  ;;  %v1076_v23 = vld [vmem:[%s2110_s5 + $0x78] sm:$0xff]  ;;  %v1070_v28 = vld [vmem:[%s2110_s5 + $0x48] sm:$0xff]  ;;  %v1079_v17 = vld [vmem:[%s2110_s5 + $0x90] sm:$0xff] }
  0x6a   :  { %992 = vmatpush.bf16.msra.mxu3 %v1616_v36  ;;  %v1441_v36 = vld [vmem:[#allocation2 + $0x38] sm:$0xf0] }
  0x6b   :  { %954 = vmatpush.bf16.msra.mxu0 %v1416_v43  ;;  %v1633_v43 = vld [vmem:[#allocation2 + $0x1b8] sm:$0xf0]  ;;  %v1444_v44 = vor.u32 %v1675_v35, %v1441_v36 }
  0x6c   :  { %967 = vmatpush.bf16.msra.mxu1 %v1480_v47  ;;  %v1673_v47 = vld [vmem:[#allocation2 + $0x24] sm:$0xf]  ;;  %v1636_v50 = vor.u32 %v1723_v42, %v1633_v43  ;;  %v1068_v36 = vld [vmem:[%s2110_s5 + $0x38] sm:$0xff] }
  0x6d   :  { %980 = vmatpush.bf16.msra.mxu2 %v1544_v48  ;;  %v1433_v48 = vld [vmem:[#allocation2 + $0x28] sm:$0xf0]  ;;  %v1064_v43 = vld [vmem:[%s2110_s5 + $0x18] sm:$0xff] }
  0x6e   :  { %993 = vmatpush.bf16.msra.mxu3 %v1608_v51  ;;  %955 = vmatmul.bf16.vlgmr.msra.gmra.mxu0 %v1972_v59  ;;  %v1705_v51 = vld [vmem:[#allocation2 + $0x124] sm:$0xf]  ;;  %v1436_v25 = vor.u32 %v1673_v47, %v1433_v48  ;;  %v1063_v47 = vld [vmem:[%s2110_s5 + $0x10] sm:$0xff]  ;;  %v1062_v48 = vld [vmem:[%s2110_s5 + $0x8] sm:$0xff] }
  0x6f   :  { %999 = vmatpush.bf16.msrb.mxu0 %v1476_v52  ;;  %968 = vmatmul.bf16.vlgmr.msra.gmra.mxu1 %v1976_v0  ;;  %v1561_v52 = vld [vmem:[#allocation2 + $0x128] sm:$0xf0] }
  0x70   :  { %1012 = vmatpush.bf16.msrb.mxu1 %v1540_v54  ;;  %981 = vmatmul.bf16.vlgmr.msra.gmra.mxu2 %v1974_v63  ;;  %v1500_v54 = vor.u32 %v1689_v49, %v1497_v9  ;;  %v1092_v49 = vld [vmem:[%s2110_s5 + $0xf8] sm:$0xff]  ;;  %v1091_v9 = vld [vmem:[%s2110_s5 + $0xf0] sm:$0xff] }
  0x71   :  { %1025 = vmatpush.bf16.msrb.mxu2 %v1604_v15  ;;  %994 = vmatmul.bf16.vlgmr.msra.gmra.mxu3 %v1978_v3  ;;  %v1564_v15 = vor.u32 %v1705_v51, %v1561_v52  ;;  %v1090_v51 = vld [vmem:[%s2110_s5 + $0xe8] sm:$0xff] }
  0x72   :  { %1038 = vmatpush.bf16.msrb.mxu3 %v1668_v58  ;;  %v1628_v58 = vor.u32 %v1721_v53, %v1625_v8  ;;  %v1089_v8 = vld [vmem:[%s2110_s5 + $0xe0] sm:$0xff] }
  0x73   :  { %1000 = vmatpush.bf16.msrb.mxu0 %v1468_v4  ;;  %v1428_v4 = vor.u32 %v1671_v55, %v1425_v56  ;;  %v1086_v55 = vld [vmem:[%s2110_s5 + $0xc8] sm:$0xff]  ;;  %v1085_v56 = vld [vmem:[%s2110_s5 + $0xc0] sm:$0xff] }
  0x74   :  { %1013 = vmatpush.bf16.msrb.mxu1 %v1532_v5  ;;  %v1492_v5 = vor.u32 %v1687_v57, %v1489_v60 }
  0x75   :  { %1026 = vmatpush.bf16.msrb.mxu2 %v1596_v6  ;;  %v1556_v6 = vor.u32 %v1703_v61, %v1553_v62  ;;  %v1083_v62 = vld [vmem:[%s2110_s5 + $0xb0] sm:$0xff] }
  0x76   :  { %1039 = vmatpush.bf16.msrb.mxu3 %v1660_v12  ;;  %v1620_v12 = vor.u32 %v1719_v1, %v1617_v2  ;;  %v1082_v1 = vld [vmem:[%s2110_s5 + $0xa8] sm:$0xff] }
  0x77   :  { %1001 = vmatpush.bf16.msrb.mxu0 %v1460_v19  ;;  %v1420_v19 = vor.u32 %v1669_v7, %v1417_v10  ;;  %v1080_v10 = vld [vmem:[%s2110_s5 + $0x98] sm:$0xff] }
  0x78   :  { %1014 = vmatpush.bf16.msrb.mxu1 %v1524_v20  ;;  %v1484_v20 = vor.u32 %v1685_v11, %v1481_v13 }
  0x79   :  { %1027 = vmatpush.bf16.msrb.mxu2 %v1588_v21  ;;  %v1548_v21 = vor.u32 %v1701_v14, %v1545_v16 }
  0x7a   :  { %1040 = vmatpush.bf16.msrb.mxu3 %v1652_v26  ;;  %v1074_v26 = vld [vmem:[%s2110_s5 + $0x68] sm:$0xff] }
  0x7b   :  { %1002 = vmatpush.bf16.msrb.mxu0 %v1452_v32  ;;  %v1069_v32 = vld [vmem:[%s2110_s5 + $0x40] sm:$0xff] }
  0x7c   :  { %1015 = vmatpush.bf16.msrb.mxu1 %v1516_v33 }
  0x7d   :  { %1028 = vmatpush.bf16.msrb.mxu2 %v1580_v34 }
  0x7e   :  { %1041 = vmatpush.bf16.msrb.mxu3 %v1644_v38 }
  0x7f   :  { %1003 = vmatpush.bf16.msrb.mxu0 %v1444_v44 }
  0x80   :  { %1016 = vmatpush.bf16.msrb.mxu1 %v1508_v45 }
  0x81   :  { %1029 = vmatpush.bf16.msrb.mxu2 %v1572_v46 }
  0x82   :  { %1042 = vmatpush.bf16.msrb.mxu3 %v1636_v50  ;;  %v1061_v50 = vld [vmem:[%s2110_s5] sm:$0xff] }
  0x83   :  { %1004 = vmatpush.bf16.msrb.mxu0 %v1436_v25  ;;  %v1088_v25 = vld [vmem:[%s2110_s5 + $0xd8] sm:$0xff] }
  0x84   :  { %1017 = vmatpush.bf16.msrb.mxu1 %v1500_v54  ;;  %v1087_v54 = vld [vmem:[%s2110_s5 + $0xd0] sm:$0xff] }
  0x85   :  { %1030 = vmatpush.bf16.msrb.mxu2 %v1564_v15 }
  0x86   :  { %1043 = vmatpush.bf16.msrb.mxu3 %v1628_v58  ;;  %v1084_v58 = vld [vmem:[%s2110_s5 + $0xb8] sm:$0xff] }
  0x87   :  { %1005 = vmatpush.bf16.msrb.mxu0 %v1428_v4 }
  0x88   :  { %1018 = vmatpush.bf16.msrb.mxu1 %v1492_v5  ;;  %v1081_v5 = vld [vmem:[%s2110_s5 + $0xa0] sm:$0xff] }
  0x89   :  { %1031 = vmatpush.bf16.msrb.mxu2 %v1556_v6  ;;  %v1051_v6 = vld [vmem:[%s2109_s4] sm:$0x3] }
  0x8a   :  { %1044 = vmatpush.bf16.msrb.mxu3 %v1620_v12  ;;  %v1053_v14 = vperm.slane %v1051_v6, 0 }
  0x8b   :  { %1006 = vmatpush.bf16.msrb.mxu0 %v1420_v19 }
  0x8c   :  { %1019 = vmatpush.bf16.msrb.mxu1 %v1484_v20  ;;  %v1078_v20 = vld [vmem:[%s2110_s5 + $0x88] sm:$0xff] }
  0x8d   :  { %1032 = vmatpush.bf16.msrb.mxu2 %v1548_v21 }
  0x8e   :  { %1045 = vmatpush.bf16.msrb.mxu3 %v1612_v22  ;;  %1007 = vmatmul.bf16.vlgmr.msrb.gmra.mxu0 %v1972_v59  ;;  %v1077_v22 = vld [vmem:[%s2110_s5 + $0x80] sm:$0xff] }
  0x8f   :  { %1020 = vmatmul.bf16.vlgmr.msrb.gmra.mxu1 %v1976_v0  ;;  %1097 = vmatpush.msra.mxu0 %v1076_v23  ;;  %v1072_v0 = vld [vmem:[%s2110_s5 + $0x58] sm:$0xff] }
  0x90   :  { %1033 = vmatmul.bf16.vlgmr.msrb.gmra.mxu2 %v1974_v63  ;;  %v1073_v63 = vld [vmem:[%s2110_s5 + $0x60] sm:$0xff]  ;;  %1117 = vmatpush.msra.mxu1 %v1092_v49 }
  0x91   :  { %1046 = vmatmul.bf16.vlgmr.msrb.gmra.mxu3 %v1978_v3  ;;  %1098 = vmatpush.msra.mxu0 %v1075_v24  ;;  %v1071_v3 = vld [vmem:[%s2110_s5 + $0x50] sm:$0xff] }
  0x92   :  { %1118 = vmatpush.msra.mxu1 %v1091_v9 }
  0x93   :  { %1099 = vmatpush.msra.mxu0 %v1074_v26 }
  0x94   :  { %1119 = vmatpush.msra.mxu1 %v1090_v51 }
  0x95   :  { %1100 = vmatpush.msra.mxu0 %v1073_v63 }
  0x96   :  { %1120 = vmatpush.msra.mxu1 %v1089_v8 }
  0x97   :  { %1101 = vmatpush.msra.mxu0 %v1072_v0 }
  0x98   :  { %1121 = vmatpush.msra.mxu1 %v1088_v25 }
  0x99   :  { %1102 = vmatpush.msra.mxu0 %v1071_v3 }
  0x9a   :  { %1122 = vmatpush.msra.mxu1 %v1087_v54 }
  0x9b   :  { %1103 = vmatpush.msra.mxu0 %v1070_v28 }
  0x9c   :  { %1123 = vmatpush.msra.mxu1 %v1086_v55 }
  0x9d   :  { %1104 = vmatpush.msra.mxu0 %v1069_v32 }
  0x9e   :  { %1124 = vmatpush.msra.mxu1 %v1085_v56 }
  0x9f   :  { %1105 = vmatpush.msra.mxu0 %v1068_v36 }
  0xa0   :  { %1125 = vmatpush.msra.mxu1 %v1084_v58 }
  0xa1   :  { %1106 = vmatpush.msra.mxu0 %v1067_v39 }
  0xa2   :  { %1126 = vmatpush.msra.mxu1 %v1083_v62 }
  0xa3   :  { %1107 = vmatpush.msra.mxu0 %v1066_v40 }
  0xa4   :  { %1127 = vmatpush.msra.mxu1 %v1082_v1 }
  0xa5   :  { %1108 = vmatpush.msra.mxu0 %v1065_v41 }
  0xa6   :  { %1128 = vmatpush.msra.mxu1 %v1081_v5 }
  0xa7   :  { %1109 = vmatpush.msra.mxu0 %v1064_v43 }
  0xa8   :  { %1129 = vmatpush.msra.mxu1 %v1080_v10 }
  0xa9   :  { %1110 = vmatpush.msra.mxu0 %v1063_v47 }
  0xaa   :  { %1130 = vmatpush.msra.mxu1 %v1079_v17 }
  0xab   :  { %v532_v59 = vpop.f32.mrf.mxu0  ;;  %1111 = vmatpush.msra.mxu0 %v1062_v48 }
  0xac   :  { %1131 = vmatpush.msra.mxu1 %v1078_v20 }
  0xad   :  { %1112 = vmatpush.msra.mxu0 %v1061_v50 }
  0xae   :  { %1132 = vmatpush.msra.mxu1 %v1077_v22 }
  0xaf   :  { %v545_v27 = vpop.f32.mrf.mxu1 }
  0xb0   :  { %v546_v15 = vadd.f32 %v545_v27, %v532_v59 }
  0xb3   :  { %v558_v29 = vpop.f32.mrf.mxu2  ;;  %v534_v31 = vpop.f32.mrf.mxu0 }
  0xb4   :  { %v571_v30 = vpop.f32.mrf.mxu3  ;;  %v559_v57 = vadd.f32 %v558_v29, %v546_v15 }
  0xb6   :  { %v572_v60 = vadd.f32 %v571_v30, %v559_v57 }
  0xb7   :  { %v547_v33 = vpop.f32.mrf.mxu1 }
  0xb8   :  { %v1054_v33 = vperm.slane %v1051_v6, 1 }
  0xbb   :  { %v560_v34 = vpop.f32.mrf.mxu2 }
  0xbc   :  { %v573_v35 = vpop.f32.mrf.mxu3 }
  0xcb   :  { %v2015_v37 = vpop.f32.mrf.mxu0 }
  0xcc   :  { %v2017_v38 = vpop.f32.mrf.mxu1 }
  0xcd   :  { %v598_v59 = vadd.f32 %v2017_v38, %v2015_v37  ;;  %v1802_v37 = vld [vmem:[%s2111_s6] ss:$0 sm:$0xff] }
  0xd3   :  { %v2028_v42 = vpop.f32.mrf.mxu2  ;;  %v586_v44 = vpop.f32.mrf.mxu0 }
  0xd4   :  { %v2033_v45 = vpop.f32.mrf.mxu3  ;;  %v599_v46 = vpop.f32.mrf.mxu1  ;;  %v611_v63 = vadd.f32 %v2028_v42, %v598_v59 }
  0xd6   :  { %v624_v0 = vadd.f32 %v2033_v45, %v611_v63 }
  0xdb   :  { %v612_v52 = vpop.f32.mrf.mxu2 }
  0xdc   :  { %v625_v53 = vpop.f32.mrf.mxu3 }
  0xeb   :  { %v956_v61 = vpop.f32.mrf.mxu0 }
  0xec   :  { %v969_v2 = vpop.f32.mrf.mxu1  ;;  %v957_v4 = vadd.f32 %v956_v61, %v572_v60 }
  0xee   :  { %v970_v7 = vadd.f32 %v969_v2, %v957_v4 }
  0xf3   :  { %v982_v11 = vpop.f32.mrf.mxu2  ;;  %v958_v16 = vpop.f32.mrf.mxu0 }
  0xf4   :  { %v983_v12 = vadd.f32 %v982_v11, %v970_v7  ;;  %v995_v13 = vpop.f32.mrf.mxu3  ;;  %v971_v18 = vpop.f32.mrf.mxu1 }
  0xf6   :  { %v996_v19 = vadd.f32 %v995_v13, %v983_v12 }
  0xf8   :  { %v1057_v21 = vadd.f32 %v1053_v14, %v996_v19 }
  0xfa   :  { %v1059_v23 = vmax.f32 %v1057_v21, 0.0 }
  0xfb   :  { %v984_v24 = vpop.f32.mrf.mxu2 }
  0xfc   :  { %1113 = vmatmul.f32.vlgmr.msra.gmra.mxu0 %v1059_v23  ;;  %v997_v26 = vpop.f32.mrf.mxu3 }
 0x10b   :  { %v1008_v3 = vpop.f32.mrf.mxu0 }
 0x10c   :  { %v1021_v27 = vpop.f32.mrf.mxu1  ;;  %v1009_v28 = vadd.f32 %v1008_v3, %v624_v0 }
 0x10e   :  { %v1022_v29 = vadd.f32 %v1021_v27, %v1009_v28 }
 0x113   :  { %v1034_v30 = vpop.f32.mrf.mxu2  ;;  %v1010_v34 = vpop.f32.mrf.mxu0 }
 0x114   :  { %v1035_v31 = vadd.f32 %v1034_v30, %v1022_v29  ;;  %v1047_v32 = vpop.f32.mrf.mxu3  ;;  %v1023_v35 = vpop.f32.mrf.mxu1 }
 0x116   :  { %v1048_v36 = vadd.f32 %v1047_v32, %v1035_v31 }
 0x118   :  { %v1058_v39 = vadd.f32 %v1054_v33, %v1048_v36 }
 0x11a   :  { %v1060_v40 = vmax.f32 %v1058_v39, 0.0 }
 0x11b   :  { %v1036_v41 = vpop.f32.mrf.mxu2 }
 0x11c   :  { %v1049_v43 = vpop.f32.mrf.mxu3  ;;  %1133 = vmatmul.f32.vlgmr.msra.gmra.mxu1 %v1060_v40 }
 0x179   :  { %v1114_v38 = vpop.f32.mrf.mxu0 }
 0x17a   :  { %v1115_v42 = vadd.f32 %v1802_v37, %v1114_v38 }
 0x199   :  { %v1134_v44 = vpop.f32.mrf.mxu1 }
 0x19a   :  { %v1135_v45 = vadd.f32 %v1134_v44, %v1115_v42 }
 0x19c   :  { %1138 = vst.msk [vmem:[#allocation7] sm:$0xff] %vm1137_vm0, %v1135_v45 }
 0x19d   :  { %1149 = dma.vmem_to_hbm [thread:$0]  %s1145_s13, 128, %s1147_s16, [#allocation4]  }
 0x19e   :  { %1879 = dma.done.wait [#allocation4], 128  }
 0x19f   :  { %1880 = vsyncadd [#allocation4], 4294967168 }
 0x1a0   :  { %1154 = vsyncpa [#allocation3], 1 }
 0x1a1   :  { %1155 = vsyncpa [#allocation6], 1 }
 0x1a2   :  { %1156 = vsyncpa [#allocation4], 1 }

</bundles_post_ra>
